<compile_context>
chip_gen: v7x
topology: tpu7x:2x2x1
jax: 0.10.0
libtpu: 0.0.40
codegen_flags: <defaults>
</compile_context>

<pallas_src>
import functools

import numpy as np
import jax
import jax.numpy as jnp
from jax.experimental import pallas as pl
from jax.experimental.pallas import tpu as pltpu


def _conv_lrelu_kernel(xcol_ref, x_ref, w_ref, o_ref, xpad_ref, patch_ref, *,
                       W, KH, KW, pad, negative_slope, mxu_dtype):
    """One batch element: fused im2col + single matmul + LeakyReLU.

    xcol_ref:  (1, H*W)   int32   x-coordinate of each flattened pixel
    x_ref:     (Cin, H*W)         activations, pixels on the lane axis
    w_ref:     (Cout, KH*KW*Cin)  weights, K ordered as (kh, kw, cin)
    o_ref:     (Cout, H*W)        output (NCHW order, flattened spatial)
    xpad_ref:  (Cin, H*W + 2*M)   VMEM scratch, zero halo, M = pad*(W+1)
    patch_ref: (KH*KW*Cin, H*W)   VMEM scratch, im2col patch matrix
    """
    Cin, HW = x_ref.shape
    M = pad * (W + 1)          # largest |flat shift| of any tap

    # Fused zero padding: drop the image in the middle of a zeroed flat buffer.
    # A (dh, dw) tap is then the contiguous lane window starting at M + dh*W+dw;
    # rows shifted past the top/bottom edge read the zero halo automatically.
    xpad_ref[...] = jnp.zeros_like(xpad_ref)
    xpad_ref[:, M:M + HW] = x_ref[...]

    xcol = xcol_ref[...]       # (1, H*W)

    # Build the im2col patch matrix P[(kh, kw, cin), y*W + x] in VMEM.
    for kh in range(KH):
        for kw in range(KW):
            dh, dw = kh - pad, kw - pad
            shift = dh * W + dw
            tap = xpad_ref[:, M + shift:M + shift + HW]        # (Cin, H*W)
            # Column halo: zero pixels whose x + dw falls outside [0, W).
            if dw > 0:
                tap = jnp.where(xcol < (W - dw), tap, 0.0)
            elif dw < 0:
                tap = jnp.where(xcol >= (-dw), tap, 0.0)
            row = (kh * KW + kw) * Cin
            patch_ref[row:row + Cin, :] = tap

    # Single MXU matmul over the whole K = KH*KW*Cin contraction (bf16 in,
    # f32 accumulate).
    acc = jnp.dot(w_ref[...].astype(mxu_dtype),
                  patch_ref[...].astype(mxu_dtype),
                  preferred_element_type=jnp.float32)          # (Cout, H*W) f32
    # Fused LeakyReLU (f32 element-wise, v5e-safe), lane-dense store.
    acc = jnp.where(acc >= 0, acc, negative_slope * acc)
    o_ref[...] = acc.astype(o_ref.dtype)


def conv_block_leaky_relu(x_nchw, w_oihw, *, stride=1, padding=1,
                          negative_slope=0.1, mxu_dtype=jnp.bfloat16):
    """Forward pass of ConvBlockLeakyRelu. Inputs in PyTorch NCHW / OIHW."""
    N, Cin, H, W = x_nchw.shape
    Cout, Cin_w, KH, KW = w_oihw.shape
    assert Cin_w == Cin
    # TODO(synk): stride > 1 and non-'same' padding (output size != input size)
    # not implemented; the module defaults (kernel=3, stride=1, padding=1) are.
    assert stride == 1, "only stride=1 supported"
    assert KH == KW == 2 * padding + 1, "only 'same' convolutions supported"

    HW = H * W
    K = KH * KW * Cin
    M = padding * (W + 1)

    # Free reshapes only: no NCHW<->NHWC transpose and no jnp.pad of x in HBM.
    x2d = x_nchw.reshape(N, Cin, HW)
    # Weight -> (Cout, KH*KW*Cin) with K ordered (kh, kw, cin); tiny tensor.
    w2d = jnp.transpose(w_oihw, (0, 2, 3, 1)).reshape(Cout, K)
    # x-coordinate of each flattened pixel (host-built constant, ~1 KiB).
    xcol = jnp.asarray(np.tile(np.arange(W, dtype=np.int32), H)[None, :])

    kernel = functools.partial(
        _conv_lrelu_kernel, W=W, KH=KH, KW=KW, pad=padding,
        negative_slope=negative_slope, mxu_dtype=mxu_dtype)

    # TODO(synk): for large images add a spatial grid axis (with halo) and set
    # vmem_limit_bytes; at these sizes one image per grid step fits easily,
    # including within v7x's 64 MiB VMEM.
    out2d = pl.pallas_call(
        kernel,
        grid=(N,),
        in_specs=[
            pl.BlockSpec((1, HW), lambda n: (0, 0)),             # xcol
            pl.BlockSpec((None, Cin, HW), lambda n: (n, 0, 0)),  # x (one image)
            pl.BlockSpec((Cout, K), lambda n: (0, 0)),           # weights
        ],
        out_specs=pl.BlockSpec((None, Cout, HW), lambda n: (n, 0, 0)),
        out_shape=jax.ShapeDtypeStruct((N, Cout, HW), x_nchw.dtype),
        scratch_shapes=[
            pltpu.VMEM((Cin, HW + 2 * M), jnp.float32),   # zero-halo image
            pltpu.VMEM((K, HW), jnp.float32),             # im2col patch matrix
        ],
        compiler_params=pltpu.CompilerParams(
            dimension_semantics=("parallel",)),
    )(xcol, x2d, w2d)

    return out2d.reshape(N, Cout, H, W)      # free reshape -> NCHW


if __name__ == "__main__":
    # Module hyperparameters (synthetic, deterministic init).
    chanel_in, chanel_out, kernel_size = 4, 8, 3
    stride, padding = 1, 1
    N, H, W = 2, 16, 16

    key = jax.random.PRNGKey(0)
    kx, kw = jax.random.split(key)
    x = jax.random.normal(kx, (N, chanel_in, H, W), dtype=jnp.float32)
    # Conv2d weight shape (out, in, kh, kw), bias=False.
    weight = jax.random.normal(
        kw, (chanel_out, chanel_in, kernel_size, kernel_size),
        dtype=jnp.float32) * 0.1

    out = conv_block_leaky_relu(x, weight, stride=stride, padding=padding,
                                negative_slope=0.1)
    out = jax.block_until_ready(out)

    # Reference check against XLA conv + leaky relu (f32).
    ref = jax.lax.conv_general_dilated(
        x, weight, window_strides=(stride, stride),
        padding=((padding, padding), (padding, padding)),
        dimension_numbers=("NCHW", "OIHW", "NCHW"))
    ref = jnp.where(ref >= 0, ref, 0.1 * ref)
    assert out.shape == ref.shape == (N, chanel_out, H, W)
    # bf16 MXU operands (f32 accumulation) -> tolerance looser than pure f32.
    err = float(jnp.max(jnp.abs(out - ref)))
    assert jnp.allclose(out, ref, atol=3e-2, rtol=3e-2), f"max abs err {err}"

    print("KERNEL_OK")
</pallas_src>

<mosaic_0001>
module attributes {stable_mosaic.version = 11 : i64} {
  func.func @_conv_lrelu_kernel(%arg0: i32, %arg1: memref<1x256xi32, #tpu.memory_space<vmem>>, %arg2: memref<1x4x256xf32, #tpu.memory_space<vmem>>, %arg3: memref<8x36xf32, #tpu.memory_space<vmem>>, %arg4: memref<1x8x256xf32, #tpu.memory_space<vmem>>, %arg5: memref<4x290xf32, #tpu.memory_space<vmem>>, %arg6: memref<36x256xf32, #tpu.memory_space<vmem>>) attributes {dimension_semantics = [#tpu.dimension_semantics<parallel>], iteration_bounds = array<i64: 2>, scalar_prefetch = 0 : i64, scratch_operands = 2 : i64, tpu.core_type = #tpu.core_type<tc>, window_params = [{pipeline_mode = #tpu.pipeline_mode<synchronous>, transform_indices = @transform_0, window_bounds = array<i64: 1, 256>}, {transform_indices = @transform_1, window_bounds = array<i64: 1, 4, 256>}, {pipeline_mode = #tpu.pipeline_mode<synchronous>, transform_indices = @transform_2, window_bounds = array<i64: 8, 36>}, {transform_indices = @transform_3, window_bounds = array<i64: 1, 8, 256>}]} {
    %cst = arith.constant 0.000000e+00 : f32
    %0 = vector.broadcast %cst : f32 to vector<4x290xf32>
    %c0 = arith.constant 0 : index
    %c0_0 = arith.constant 0 : index
    %1 = vector.load %arg5[%c0, %c0_0] : memref<4x290xf32, #tpu.memory_space<vmem>>, vector<4x290xf32>
    tpu.vector_store %arg5[%c0, %c0_0], %0 {strides = array<i32>} : memref<4x290xf32, #tpu.memory_space<vmem>>, vector<4x290xf32>,
    %c0_1 = arith.constant 0 : index
    %c0_2 = arith.constant 0 : index
    %c0_3 = arith.constant 0 : index
    %2 = vector.load %arg2[%c0_1, %c0_2, %c0_3] : memref<1x4x256xf32, #tpu.memory_space<vmem>>, vector<1x4x256xf32>
    %3 = vector.shape_cast %2 : vector<1x4x256xf32> to vector<4x256xf32>
    %c0_4 = arith.constant 0 : index
    %c17 = arith.constant 17 : index
    %4 = vector.load %arg5[%c0_4, %c17] : memref<4x290xf32, #tpu.memory_space<vmem>>, vector<4x256xf32>
    tpu.vector_store %arg5[%c0_4, %c17], %3 {strides = array<i32>} : memref<4x290xf32, #tpu.memory_space<vmem>>, vector<4x256xf32>,
    %c0_5 = arith.constant 0 : index
    %c0_6 = arith.constant 0 : index
    %5 = vector.load %arg1[%c0_5, %c0_6] : memref<1x256xi32, #tpu.memory_space<vmem>>, vector<1x256xi32>
    %c0_7 = arith.constant 0 : index
    %c0_8 = arith.constant 0 : index
    %6 = vector.load %arg5[%c0_7, %c0_8] : memref<4x290xf32, #tpu.memory_space<vmem>>, vector<4x256xf32>
    %c1_i32 = arith.constant 1 : i32
    %7 = vector.broadcast %c1_i32 : i32 to vector<1x256xi32>
    %8 = arith.cmpi sge, %5, %7 : vector<1x256xi32>
    %cst_9 = arith.constant 0.000000e+00 : f32
    %9 = vector.shape_cast %8 : vector<1x256xi1> to vector<1x256xi1>
    %10 = vector.broadcast %9 : vector<1x256xi1> to vector<4x256xi1>
    %11 = vector.broadcast %cst_9 : f32 to vector<4x256xf32>
    %12 = arith.select %10, %6, %11 : vector<4x256xi1>, vector<4x256xf32>
    %c0_10 = arith.constant 0 : index
    %c0_11 = arith.constant 0 : index
    %13 = vector.load %arg6[%c0_10, %c0_11] : memref<36x256xf32, #tpu.memory_space<vmem>>, vector<4x256xf32>
    tpu.vector_store %arg6[%c0_10, %c0_11], %12 {strides = array<i32>} : memref<36x256xf32, #tpu.memory_space<vmem>>, vector<4x256xf32>,
    %c0_12 = arith.constant 0 : index
    %c1 = arith.constant 1 : index
    %14 = vector.load %arg5[%c0_12, %c1] : memref<4x290xf32, #tpu.memory_space<vmem>>, vector<4x256xf32>
    %c4 = arith.constant 4 : index
    %c0_13 = arith.constant 0 : index
    %15 = vector.load %arg6[%c4, %c0_13] : memref<36x256xf32, #tpu.memory_space<vmem>>, vector<4x256xf32>
    tpu.vector_store %arg6[%c4, %c0_13], %14 {strides = array<i32>} : memref<36x256xf32, #tpu.memory_space<vmem>>, vector<4x256xf32>,
    %c0_14 = arith.constant 0 : index
    %c2 = arith.constant 2 : index
    %16 = vector.load %arg5[%c0_14, %c2] : memref<4x290xf32, #tpu.memory_space<vmem>>, vector<4x256xf32>
    %c15_i32 = arith.constant 15 : i32
    %17 = vector.broadcast %c15_i32 : i32 to vector<1x256xi32>
    %18 = arith.cmpi slt, %5, %17 : vector<1x256xi32>
    %cst_15 = arith.constant 0.000000e+00 : f32
    %19 = vector.shape_cast %18 : vector<1x256xi1> to vector<1x256xi1>
    %20 = vector.broadcast %19 : vector<1x256xi1> to vector<4x256xi1>
    %21 = vector.broadcast %cst_15 : f32 to vector<4x256xf32>
    %22 = arith.select %20, %16, %21 : vector<4x256xi1>, vector<4x256xf32>
    %c8 = arith.constant 8 : index
    %c0_16 = arith.constant 0 : index
    %23 = vector.load %arg6[%c8, %c0_16] : memref<36x256xf32, #tpu.memory_space<vmem>>, vector<4x256xf32>
    tpu.vector_store %arg6[%c8, %c0_16], %22 {strides = array<i32>} : memref<36x256xf32, #tpu.memory_space<vmem>>, vector<4x256xf32>,
    %c0_17 = arith.constant 0 : index
    %c16 = arith.constant 16 : index
    %24 = vector.load %arg5[%c0_17, %c16] : memref<4x290xf32, #tpu.memory_space<vmem>>, vector<4x256xf32>
    %c1_i32_18 = arith.constant 1 : i32
    %25 = vector.broadcast %c1_i32_18 : i32 to vector<1x256xi32>
    %26 = arith.cmpi sge, %5, %25 : vector<1x256xi32>
    %cst_19 = arith.constant 0.000000e+00 : f32
    %27 = vector.shape_cast %26 : vector<1x256xi1> to vector<1x256xi1>
    %28 = vector.broadcast %27 : vector<1x256xi1> to vector<4x256xi1>
    %29 = vector.broadcast %cst_19 : f32 to vector<4x256xf32>
    %30 = arith.select %28, %24, %29 : vector<4x256xi1>, vector<4x256xf32>
    %c12 = arith.constant 12 : index
    %c0_20 = arith.constant 0 : index
    %31 = vector.load %arg6[%c12, %c0_20] : memref<36x256xf32, #tpu.memory_space<vmem>>, vector<4x256xf32>
    tpu.vector_store %arg6[%c12, %c0_20], %30 {strides = array<i32>} : memref<36x256xf32, #tpu.memory_space<vmem>>, vector<4x256xf32>,
    %c0_21 = arith.constant 0 : index
    %c17_22 = arith.constant 17 : index
    %32 = vector.load %arg5[%c0_21, %c17_22] : memref<4x290xf32, #tpu.memory_space<vmem>>, vector<4x256xf32>
    %c16_23 = arith.constant 16 : index
    %c0_24 = arith.constant 0 : index
    %33 = vector.load %arg6[%c16_23, %c0_24] : memref<36x256xf32, #tpu.memory_space<vmem>>, vector<4x256xf32>
    tpu.vector_store %arg6[%c16_23, %c0_24], %32 {strides = array<i32>} : memref<36x256xf32, #tpu.memory_space<vmem>>, vector<4x256xf32>,
    %c0_25 = arith.constant 0 : index
    %c18 = arith.constant 18 : index
    %34 = vector.load %arg5[%c0_25, %c18] : memref<4x290xf32, #tpu.memory_space<vmem>>, vector<4x256xf32>
    %c15_i32_26 = arith.constant 15 : i32
    %35 = vector.broadcast %c15_i32_26 : i32 to vector<1x256xi32>
    %36 = arith.cmpi slt, %5, %35 : vector<1x256xi32>
    %cst_27 = arith.constant 0.000000e+00 : f32
    %37 = vector.shape_cast %36 : vector<1x256xi1> to vector<1x256xi1>
    %38 = vector.broadcast %37 : vector<1x256xi1> to vector<4x256xi1>
    %39 = vector.broadcast %cst_27 : f32 to vector<4x256xf32>
    %40 = arith.select %38, %34, %39 : vector<4x256xi1>, vector<4x256xf32>
    %c20 = arith.constant 20 : index
    %c0_28 = arith.constant 0 : index
    %41 = vector.load %arg6[%c20, %c0_28] : memref<36x256xf32, #tpu.memory_space<vmem>>, vector<4x256xf32>
    tpu.vector_store %arg6[%c20, %c0_28], %40 {strides = array<i32>} : memref<36x256xf32, #tpu.memory_space<vmem>>, vector<4x256xf32>,
    %c0_29 = arith.constant 0 : index
    %c32 = arith.constant 32 : index
    %42 = vector.load %arg5[%c0_29, %c32] : memref<4x290xf32, #tpu.memory_space<vmem>>, vector<4x256xf32>
    %c1_i32_30 = arith.constant 1 : i32
    %43 = vector.broadcast %c1_i32_30 : i32 to vector<1x256xi32>
    %44 = arith.cmpi sge, %5, %43 : vector<1x256xi32>
    %cst_31 = arith.constant 0.000000e+00 : f32
    %45 = vector.shape_cast %44 : vector<1x256xi1> to vector<1x256xi1>
    %46 = vector.broadcast %45 : vector<1x256xi1> to vector<4x256xi1>
    %47 = vector.broadcast %cst_31 : f32 to vector<4x256xf32>
    %48 = arith.select %46, %42, %47 : vector<4x256xi1>, vector<4x256xf32>
    %c24 = arith.constant 24 : index
    %c0_32 = arith.constant 0 : index
    %49 = vector.load %arg6[%c24, %c0_32] : memref<36x256xf32, #tpu.memory_space<vmem>>, vector<4x256xf32>
    tpu.vector_store %arg6[%c24, %c0_32], %48 {strides = array<i32>} : memref<36x256xf32, #tpu.memory_space<vmem>>, vector<4x256xf32>,
    %c0_33 = arith.constant 0 : index
    %c33 = arith.constant 33 : index
    %50 = vector.load %arg5[%c0_33, %c33] : memref<4x290xf32, #tpu.memory_space<vmem>>, vector<4x256xf32>
    %c28 = arith.constant 28 : index
    %c0_34 = arith.constant 0 : index
    %51 = vector.load %arg6[%c28, %c0_34] : memref<36x256xf32, #tpu.memory_space<vmem>>, vector<4x256xf32>
    tpu.vector_store %arg6[%c28, %c0_34], %50 {strides = array<i32>} : memref<36x256xf32, #tpu.memory_space<vmem>>, vector<4x256xf32>,
    %c0_35 = arith.constant 0 : index
    %c34 = arith.constant 34 : index
    %52 = vector.load %arg5[%c0_35, %c34] : memref<4x290xf32, #tpu.memory_space<vmem>>, vector<4x256xf32>
    %c15_i32_36 = arith.constant 15 : i32
    %53 = vector.broadcast %c15_i32_36 : i32 to vector<1x256xi32>
    %54 = arith.cmpi slt, %5, %53 : vector<1x256xi32>
    %cst_37 = arith.constant 0.000000e+00 : f32
    %55 = vector.shape_cast %54 : vector<1x256xi1> to vector<1x256xi1>
    %56 = vector.broadcast %55 : vector<1x256xi1> to vector<4x256xi1>
    %57 = vector.broadcast %cst_37 : f32 to vector<4x256xf32>
    %58 = arith.select %56, %52, %57 : vector<4x256xi1>, vector<4x256xf32>
    %c32_38 = arith.constant 32 : index
    %c0_39 = arith.constant 0 : index
    %59 = vector.load %arg6[%c32_38, %c0_39] : memref<36x256xf32, #tpu.memory_space<vmem>>, vector<4x256xf32>
    tpu.vector_store %arg6[%c32_38, %c0_39], %58 {strides = array<i32>} : memref<36x256xf32, #tpu.memory_space<vmem>>, vector<4x256xf32>,
    %c0_40 = arith.constant 0 : index
    %c0_41 = arith.constant 0 : index
    %60 = vector.load %arg3[%c0_40, %c0_41] : memref<8x36xf32, #tpu.memory_space<vmem>>, vector<8x36xf32>
    %61 = arith.truncf %60 : vector<8x36xf32> to vector<8x36xbf16>
    %c0_42 = arith.constant 0 : index
    %c0_43 = arith.constant 0 : index
    %62 = vector.load %arg6[%c0_42, %c0_43] : memref<36x256xf32, #tpu.memory_space<vmem>>, vector<36x256xf32>
    %63 = arith.truncf %62 : vector<36x256xf32> to vector<36x256xbf16>
    %cst_44 = arith.constant dense<0.000000e+00> : vector<8x256xf32>
    %64 = tpu.matmul %61, %63, %cst_44 {dimension_numbers = #tpu.dot_dimension_numbers<[1], [0], [0], [1], [0, 0, 1, 1], [], []>} : vector<8x36xbf16>, vector<36x256xbf16>, vector<8x256xf32> -> vector<8x256xf32>
    %cst_45 = arith.constant 0.000000e+00 : f32
    %65 = vector.broadcast %cst_45 : f32 to vector<8x256xf32>
    %66 = arith.cmpf oge, %64, %65 : vector<8x256xf32>
    %cst_46 = arith.constant 1.000000e-01 : f32
    %67 = vector.broadcast %cst_46 : f32 to vector<8x256xf32>
    %68 = arith.mulf %67, %64 : vector<8x256xf32>
    %69 = arith.select %66, %64, %68 : vector<8x256xi1>, vector<8x256xf32>
    %c0_47 = arith.constant 0 : index
    %c0_48 = arith.constant 0 : index
    %c0_49 = arith.constant 0 : index
    %70 = vector.load %arg4[%c0_47, %c0_48, %c0_49] : memref<1x8x256xf32, #tpu.memory_space<vmem>>, vector<1x8x256xf32>
    %71 = vector.shape_cast %70 : vector<1x8x256xf32> to vector<8x256xf32>
    %72 = vector.shape_cast %69 : vector<8x256xf32> to vector<1x8x256xf32>
    tpu.vector_store %arg4[%c0_47, %c0_48, %c0_49], %72 {strides = array<i32>} : memref<1x8x256xf32, #tpu.memory_space<vmem>>, vector<1x8x256xf32>,
    return
  }
  func.func @transform_0(%arg0: i32) -> (i32, i32) {
    %c0_i32 = arith.constant 0 : i32
    %c0_i32_0 = arith.constant 0 : i32
    %c0_i32_1 = arith.constant 0 : i32
    return %c0_i32, %c0_i32_0 : i32, i32
  }
  func.func @transform_1(%arg0: i32) -> (i32, i32, i32) {
    %c0_i32 = arith.constant 0 : i32
    %c0_i32_0 = arith.constant 0 : i32
    %c0_i32_1 = arith.constant 0 : i32
    return %arg0, %c0_i32, %c0_i32_0 : i32, i32, i32
  }
  func.func @transform_2(%arg0: i32) -> (i32, i32) {
    %c0_i32 = arith.constant 0 : i32
    %c0_i32_0 = arith.constant 0 : i32
    %c0_i32_1 = arith.constant 0 : i32
    return %c0_i32, %c0_i32_0 : i32, i32
  }
  func.func @transform_3(%arg0: i32) -> (i32, i32, i32) {
    %c0_i32 = arith.constant 0 : i32
    %c0_i32_0 = arith.constant 0 : i32
    %c0_i32_1 = arith.constant 0 : i32
    return %arg0, %c0_i32, %c0_i32_0 : i32, i32, i32
  }
}

</mosaic_0001>

<bundles_post_ra>
// kernel: tpu_custom_call.1
= control target key start
LH: loop header
LB: loop body
LE: loop exit
PB: predicated region body
PF: predicated region fallthrough
CT: control target
= control target key end

     0   :  { %8 = vsyncpa [#allocation5], 0  ;;  %s1217_s0 = inlined_call_operand.hbm [shape: s32[1,256], index: 0, kind: input, shape index: {}]   ;;  %s1218_s1 = inlined_call_operand.hbm [shape: f32[2,4,256], index: 1, kind: input, shape index: {}]   ;;  %s1219_s2 = inlined_call_operand.hbm [shape: f32[8,36], index: 2, kind: input, shape index: {}]   ;;  %s1220_s3 = inlined_call_operand.hbm [shape: f32[2,8,256], index: 3, kind: output, shape index: {}]  }
   0x1   :  { %9 = vsyncpa [#allocation8], 0 }
   0x2   :  { %11 = vsyncpa [#allocation8 + $0x1], 0 }
   0x3   :  { %12 = vsyncpa [#allocation6], 0 }
   0x4   :  { %14 = vsyncpa [#allocation6 + $0x1], 0  ;;  %s917_s12 = smov 0   ;;  %s919_s13 = smov 0  }
   0x5   :  { %s921_s14 = smov 0   ;;  %s923_s15 = smov 0  }
   0x6 LB: > { %s938_s16 = sadd.s32 4294967295, %s880_s15   ;;  %s616_s17 = sadd.s32 4294967294, %s880_s15   ;;  %s880_s15 = sphi %s923_s15, %s1242_s15   ;;  %s876_s14 = sphi %s921_s14, %s1241_s14   ;;  %s872_s13 = sphi %s919_s13, %s1240_s13   ;;  %s868_s12 = sphi %s917_s12, %s1239_s12  }
   0x7   : > { %p61_p0 = scmp.ne.s32.totalorder %s872_s13, %s868_s12  ;;  %p1221_p1 = scmp.eq.s32.totalorder %s938_s16, 0 }
   0x8   : > { %p112_p3 = scmp.eq.s32.totalorder %s616_s17, 1  ;;  %p617_p5 = scmp.ge.s32.totalorder %s880_s15, 1 }
   0x9   : > { %p947_p4 = por %p1221_p1, %p61_p0  ;;  %p119_p7 = scmp.lt.s32.totalorder %s880_s15, 3 }
   0xa   : > { %p952_p6 = por %p112_p3, %p61_p0  ;;  %s882_s21 = smov [#allocation9]  }
   0xb   : > { %s1224_s18 = scalar_select %p947_p4, 1, 0 }
   0xc   : > { %s1225_s19 = scalar_select %p952_p6, 1, 0 }
   0xd   : > { %p957_p8 = pnand %p617_p5, %p119_p7  ;;  %s143_s22 = sshll.u32 %s882_s21, 4  ;;  %s144_s22 = int_to_ptr.vmem [resolvable:$true] %s143_s22 }
   0xe   : > { %s883_s23 = smov [#allocation4]   ;;  %s973_s26 = sadd.s32 1, %s880_s15  }
   0xf   : > { %s1226_s20 = scalar_select %p957_p8, 1, 0 }
  0x10   : > { %p650_p10 = pneg %p957_p8  ;;  %s132_s24 = sshll.u32 %s883_s23, 4  ;;  %s970_s24 = int_to_ptr.vmem [resolvable:$true] %s132_s24 }
  0x11   : > { %s45_s27 = ssub.s32 %s880_s15, %s973_s26  ;;  %s720_s30 = scalar_lea.hbm %s1219_s2, 128 }
  0x12   : > { %p966_p11 = pnand %p650_p10, %p1221_p1  ;;  %p721_p12 = scmp.ne.s32.totalorder %s1219_s2, %s720_s30 }
  0x13   : > { %p727_p5 = scmp.lt.u32.totalorder %s720_s30, %s1219_s2 }
  0x14   : > { %p722_p13 = pneg %p966_p11 }
  0x16   : > { %p723_p0 = pnand %p722_p13, %p721_p12 }
  0x18   : > { %p724_p3 = pneg %p723_p0 }
  0x1a   : > { %p729_p7 = pnand %p727_p5, %p724_p3 }
  0x1c   : > { %732 = shalt.err (!%p729_p7)
}
  0x1d   : > { %s733_s8 = scalar_lea.vmem %s144_s22, 128  ;;  %p741_p2 = scmp.lt.s32.totalorder %s144_s22, %s144_s22 }
  0x1e   : > { %p734_p10 = scmp.ne.s32.totalorder %s144_s22, %s733_s8  ;;  %p742_p6 = scmp.lt.s32.totalorder %s733_s8, %s733_s8 }
  0x20   : > { %p736_p9 = pnand %p734_p10, %p722_p13  ;;  %p743_p4 = por %p742_p6, %p741_p2 }
  0x22   : > { %p737_p1 = pneg %p736_p9 }
  0x24   : > { %p744_p8 = pnand %p743_p4, %p737_p1 }
  0x26   : > { %747 = shalt.err (!%p744_p8)
}
  0x27   : > { %656 = dma.hbm_to_vmem [thread:$0]  (!%p966_p11), %s1219_s2, 128, %s144_s22, [#allocation8]  }
  0x28   : > { %s748_s21 = scalar_lea.hbm %s1217_s0, 32 }
  0x29   : > { %p749_p9 = scmp.ne.s32.totalorder %s1217_s0, %s748_s21  ;;  %p755_p4 = scmp.lt.u32.totalorder %s748_s21, %s1217_s0 }
  0x2b   : > { %p751_p2 = pnand %p749_p9, %p722_p13 }
  0x2d   : > { %p752_p1 = pneg %p751_p2 }
  0x2f   : > { %p757_p6 = pnand %p755_p4, %p752_p1 }
  0x31   : > { %760 = shalt.err (!%p757_p6)
}
  0x32   : > { %s761_s22 = scalar_lea.vmem %s970_s24, 32  ;;  %p769_p3 = scmp.lt.s32.totalorder %s970_s24, %s970_s24 }
  0x33   : > { %p762_p8 = scmp.ne.s32.totalorder %s970_s24, %s761_s22  ;;  %p770_p5 = scmp.lt.s32.totalorder %s761_s22, %s761_s22 }
  0x35   : > { %p764_p12 = pnand %p762_p8, %p722_p13  ;;  %p771_p7 = por %p770_p5, %p769_p3 }
  0x37   : > { %p765_p0 = pneg %p764_p12 }
  0x39   : > { %p772_p10 = pnand %p771_p7, %p765_p0 }
  0x3b   : > { %775 = shalt.err (!%p772_p10)
}
  0x3c   : > { %653 = dma.hbm_to_vmem [thread:$0]  (!%p966_p11), %s1217_s0, 32, %s970_s24, [#allocation5]  }
  0x3d   : > { %p46_p13 = scmp.eq.s32.totalorder %s45_s27, 0  ;;  %s48_s25 = sadd.s32 1, %s876_s14 }
  0x3e   : > { %p55_p9 = scmp.ne.s32.totalorder %s876_s14, %s872_s13  ;;  %p56_p2 = scmp.eq.s32.totalorder %s880_s15, 0 }
  0x3f   : > { %s1032_s6 = scalar_select %p46_p13, %s876_s14, %s48_s25  }
  0x40   : > { %p57_p1 = por %p56_p2, %p55_p9  ;;  %p1228_p4 = scmp.eq.s32.totalorder %s938_s16, 1 }
  0x41   : > { %p667_p8 = scmp.lt.s32.totalorder %s880_s15, 2  ;;  %s154_s8 = sand.u32 1, %s880_s15  }
  0x42   : > { %p1036_p6 = por %p1228_p4, %p55_p9  ;;  %s156_s9 = sand.u32 1, %s876_s14  }
  0x43   : > { %s621_s10 = sshll.u32 %s156_s9, 3  ;;  %s636_s11 = sshll.u32 %s880_s15, 7 }
  0x44   : > { %s1047_s27 = scalar_lea.hbm %s1218_s1, %s636_s11  ;;  %s158_s21 = scalar_lea.vmem [#allocation7], %s621_s10 }
  0x45   : > { %s166_s23 = sshll.u32 %s158_s21, 4  ;;  %p1049_p11 = pnand %p667_p8, %p57_p1  ;;  %s1053_s23 = int_to_ptr.vmem [resolvable:$true] %s166_s23 }
  0x46   : > { %s155_s29 = scalar_lea.sflag [#allocation8], %s154_s8  ;;  %s776_s30 = scalar_lea.hbm %s1047_s27, 128 }
  0x47   : > { %p777_p12 = scmp.ne.s32.totalorder %s1047_s27, %s776_s30  ;;  %p778_p0 = pneg %p1049_p11 }
  0x48   : > { %s781_s5 = scalar_lea.hbm %s1218_s1, 256  ;;  %p782_p7 = scmp.lt.u32.totalorder %s1047_s27, %s1218_s1 }
  0x49   : > { %p779_p3 = pnand %p778_p0, %p777_p12  ;;  %p783_p10 = scmp.lt.u32.totalorder %s781_s5, %s776_s30 }
  0x4a   : > { %p785_p9 = scmp.lt.u32.totalorder %s776_s30, %s1047_s27 }
  0x4b   : > { %p780_p5 = pneg %p779_p3  ;;  %p784_p13 = por %p783_p10, %p782_p7 }
  0x4d   : > { %p786_p2 = por %p785_p9, %p784_p13 }
  0x4f   : > { %p787_p1 = pnand %p786_p2, %p780_p5 }
  0x51   : > { %790 = shalt.err (!%p787_p1)
}
  0x52   : > { %s791_s8 = scalar_lea.vmem %s1053_s23, 128  ;;  %s884_s10 = smov [#allocation7]  }
  0x53   : > { %p792_p4 = scmp.ne.s32.totalorder %s1053_s23, %s791_s8  ;;  %s796_s11 = sshll.u32 %s884_s10, 4  ;;  %s797_s11 = int_to_ptr.vmem [resolvable:$false] %s796_s11 }
  0x54   : > { %s798_s17 = scalar_lea.vmem %s797_s11, 256  ;;  %p799_p3 = scmp.lt.s32.totalorder %s1053_s23, %s797_s11 }
  0x55   : > { %p794_p8 = pnand %p792_p4, %p778_p0  ;;  %p800_p7 = scmp.lt.s32.totalorder %s798_s17, %s791_s8 }
  0x57   : > { %p795_p12 = pneg %p794_p8  ;;  %p801_p10 = por %p800_p7, %p799_p3 }
  0x59   : > { %p802_p13 = pnand %p801_p10, %p795_p12 }
  0x5b   : > { %805 = shalt.err (!%p802_p13)
}
  0x5c   : > { %660 = dma.hbm_to_vmem [thread:$0]  (!%p1049_p11), %s1047_s27, 128, %s1053_s23, %s155_s29  }
  0x5d   : > { %p1231_p5 = scmp.ne.s32.totalorder %s1226_s20, 0 }
  0x5e   : > { %p1232_p0 = scmp.eq.s32.totalorder (!%p1231_p5), %s938_s16, 0 }
  0x5f   : > { %175 = sbr.rel (%p1231_p5) target bundleno = 644 (0x284), region = 32 }
  0x66   : > { %851 = dma.done.wait (%p1232_p0), [#allocation5], 32   ;;  %p1233_p9 = pmov %p1232_p0 }
  0x67   : > { %s181_s24 = sand.u32 1, %s938_s16   ;;  %s1088_s21 = sand.u32 1, %s872_s13  }
  0x68   : > { %853 = vsyncadd (%p1233_p9), [#allocation5], 4294967264  ;;  %s626_s28 = sshll.u32 %s1088_s21, 3  ;;  %s182_s30 = scalar_lea.sflag [#allocation8], %s181_s24 }
  0x69   : > { %s185_s22 = scalar_lea.vmem [#allocation7], %s626_s28  ;;  %p1234_p11 = scmp.ne.s32.totalorder %s1224_s18, 0 }
  0x6b   : > { %855 = dma.done.wait (%p1234_p11), %s182_s30, 128  }
  0x6c   : > { %857 = vsyncadd (%p1234_p11), %s182_s30, 4294967168  ;;  %p1235_p2 = pmov %p1232_p0 }
  0x6d   : > { %p1236_p1 = pmov %p1232_p0 }
  0x6e   : > { %859 = dma.done.wait (%p1235_p2), [#allocation8], 128  }
  0x6f   : > { %861 = vsyncadd (%p1236_p1), [#allocation8], 4294967168  ;;  %vm214_vm0 = vcmask 273408   ;;  %v885_v0 = vmov 0.0   ;;  %v886_v1 = vmov 0   ;;  %v216_v2 = vld [vmem:[%s185_s22] sm:$0xff]  ;;  %v235_v3 = vlaneseq }
  0x70   : > { %213 = vst [vmem:[#allocation2] sm:$0xff] %v885_v0  ;;  %215 = vst.msk [vmem:[#allocation2 + $0x8] sm:$0xf] %vm214_vm0, %v885_v0  ;;  %493 = vmatprep.mubr.bf16.mxu0 %v886_v1  ;;  %s887_s20 = smov 17   ;;  %v1100_v4 = vld [vmem:[#allocation4] sm:$0x3] }
  0x71   : > { %218 = vrot.lane.b32.xlu0 %v216_v2, %s887_s20  ;;  %vm225_vm1 = vcmask 1043592   ;;  %vm226_vm2 = vcmask 1047556   ;;  %v1102_v5 = vshrl.u32 %v235_v3, 7  ;;  %vm221_vm3 = vcmask 138240   ;;  %s888_s18 = smov 96   ;;  %s889_s27 = smov 112  }
  0x72   : > { %vm229_vm4 = vcmask 134144   ;;  %vm233_vm5 = vcmp.ge.s32.totalorder %v1100_v4, 1  ;;  %vm227_vm6 = vmor %vm226_vm2, %vm225_vm1  ;;  %s890_s23 = smov 111   ;;  %s891_s29 = smov 126   ;;  %vm264_vm9 = vcmask 1039360   ;;  %vm273_vm10 = vcmp.lt.s32.totalorder %v1100_v4, 15 }
  0x73   : > { %v237_v8 = vsub.s32 0, %v1102_v5  ;;  %v234_v10 = vsel %vm233_vm5, 1, %v886_v1  ;;  %v241_v11 = vsub.s32 1, %v1102_v5  ;;  %s892_s4 = smov 110   ;;  %s893_s5 = smov 127   ;;  %vm405_vm11 = vcmask 777216  }
  0x74   : > { %s894_s25 = smov 95   ;;  %s895_s9 = smov 94   ;;  %v274_v42 = vsel %vm273_vm10, 1, %v886_v1  ;;  %vm314_vm12 = vcmask 916480   ;;  %vm294_vm13 = vcmask 1031168   ;;  %vm384_vm14 = vcmask 785408  }
  0x75   : > { %v1110_v12 = vrot.slane %v234_v10, %v237_v8  ;;  %v1114_v13 = vrot.slane %v234_v10, %v241_v11  ;;  %v1134_v44 = vrot.slane %v274_v42, %v237_v8  ;;  %v1138_v45 = vrot.slane %v274_v42, %v241_v11  ;;  %s628_s8 = sshll.u32 %s1088_s21, 4  ;;  %s637_s10 = sshll.u32 %s938_s16, 8 }
  0x76   : > { %vm358_vm1 = vcmask 900096   ;;  %vm340_vm2 = vcmask 908288   ;;  %vm450_vm5 = vcmask 293888   ;;  %s211_s11 = scalar_lea.vmem [#allocation10], %s628_s8  ;;  %s1173_s30 = scalar_lea.hbm %s1220_s3, %s637_s10 }
  0x77   : > { %vm243_vm7 = vcmp.eq.s32.totalorder %v1110_v12, 1  ;;  %vm244_vm8 = vcmp.eq.s32.totalorder %v1114_v13, 1  ;;  %vm283_vm15 = vcmp.eq.s32.totalorder %v1134_v44, 1  ;;  %vm284_vm0 = vcmp.eq.s32.totalorder %v1138_v45, 1  ;;  %s525_s17 = sshll.u32 %s211_s11, 4  ;;  %s511_s16 = scalar_lea.sflag [#allocation6], %s1088_s21  ;;  %s1175_s17 = int_to_ptr.vmem [resolvable:$true] %s525_s17 }
  0x78   : > { %s806_s22 = scalar_lea.vmem %s1175_s17, 256  ;;  %s896_s20 = smov [#allocation10]  }
  0x79   : > { %p807_p4 = scmp.ne.s32.totalorder %s1175_s17, %s806_s22 }
  0x7b   : > { %p808_p8 = pnand %p807_p4, %p1036_p6 }
  0x7d   : > { %p809_p12 = pneg %p808_p8 }
  0xe3   : > { %v219_v6 = vpop.permute.xlu0 %218 }
  0xe4   : > { %v220_v7 = vrot.slane %v219_v6, 4 }
  0xe6   : > { %v222_v9 = vsel %vm221_vm3, %v220_v7, %v219_v6  ;;  %230 = vst.msk [vmem:[#allocation2 + $0x8] sm:$0xf] %vm229_vm4, %v220_v7  ;;  %vm423_vm3 = vcmask 769024   ;;  %vm454_vm4 = vcmask 1041408  }
  0xe7   : > { %228 = vst.msk [vmem:[#allocation2] sm:$0xff] %vm227_vm6, %v222_v9 }
  0xed   : > { %v374_v14 = vld [vmem:[#allocation2 + $0x8] sm:$0xf] }
  0xee   : > { %v304_v15 = vld [vmem:[#allocation2 + $0x8] sm:$0xf]  ;;  %382 = vrot.lane.b32.xlu0 %v374_v14, %s888_s18  ;;  %v252_v16 = vld [vmem:[#allocation2] sm:$0xff] }
  0xef   : > { %312 = vrot.lane.b32.xlu1 %v304_v15, %s889_s27  ;;  %v307_v17 = vcombine.high %v252_v16, %v252_v16  ;;  %v248_v18 = vsel %vm243_vm7, %v252_v16, 0.0  ;;  %v330_v19 = vld [vmem:[#allocation2 + $0x8] sm:$0xf]  ;;  %v256_v25 = vcombine.low %v252_v16, %v252_v16 }
  0xf0   : > { %v272_v20 = vld [vmem:[#allocation2 + $0x8] sm:$0xf]  ;;  %250 = vst [vmem:[#allocation3] sm:$0xf] %v248_v18 }
  0xf1   : > { %v249_v21 = vsel %vm244_vm8, %v307_v17, 0.0  ;;  %v348_v22 = vld [vmem:[#allocation2 + $0x8] sm:$0xf] }
  0xf2   : > { %338 = vrot.lane.b32.xlu0 %v330_v19, %s890_s23  ;;  %251 = vst [vmem:[#allocation3 + $0x8] sm:$0xf] %v249_v21  ;;  %v718_v23 = vld [vmem:[#allocation2 + $0x8] ss:$0 sps:$4 sm:$0xff]  }
  0xf3   : > { %292 = vrot.lane.b32.xlu1 %v272_v20, %s891_s29  ;;  %v719_v24 = vld [vmem:[#allocation2 + $0x8] ss:$0 sps:$4 sm:$0xff]  }
  0xf4   : > { %v413_v26 = vld [vmem:[#allocation2 + $0x8] sm:$0xf] }
  0xf6   : > { %260 = vrot.lane.b32.xlu0 %v252_v16, %s893_s5 }
  0xf7   : > { %356 = vrot.lane.b32.xlu1 %v348_v22, %s892_s4 }
  0xfa   : > { %288 = vrot.lane.b32.xlu0 %v252_v16, %s891_s29 }
  0xfb   : > { %308 = vrot.lane.b32.xlu1 %v252_v16, %s889_s27 }
  0xfe   : > { %352 = vrot.lane.b32.xlu0 %v252_v16, %s892_s4 }
  0xff   : > { %378 = vrot.lane.b32.xlu1 %v252_v16, %s888_s18 }
 0x102   : > { %401 = vrot.lane.b32.xlu0 %v252_v16, %s894_s25 }
 0x103   : > { %262 = vrot.lane.b32.xlu1 %v718_v23, %s893_s5 }
 0x106   : > { %334 = vrot.lane.b32.xlu0 %v252_v16, %s890_s23 }
 0x107   : > { %403 = vrot.lane.b32.xlu1 %v719_v24, %s894_s25 }
 0x10a   : > { %310 = vrot.lane.b32.xlu0 %v307_v17, %s889_s27 }
 0x10b   : > { %258 = vrot.lane.b32.xlu1 %v256_v25, %s893_s5 }
 0x10e   : > { %290 = vrot.lane.b32.xlu0 %v307_v17, %s891_s29 }
 0x10f   : > { %380 = vrot.lane.b32.xlu1 %v307_v17, %s888_s18  ;;  %s810_s18 = sshll.u32 %s896_s20, 4  ;;  %s811_s18 = int_to_ptr.vmem [resolvable:$false] %s810_s18 }
 0x110   : > { %s812_s27 = scalar_lea.vmem %s811_s18, 512  ;;  %p813_p3 = scmp.lt.s32.totalorder %s1175_s17, %s811_s18 }
 0x111   : > { %p814_p7 = scmp.lt.s32.totalorder %s812_s27, %s806_s22 }
 0x112   : > { %354 = vrot.lane.b32.xlu0 %v307_v17, %s892_s4 }
 0x113   : > { %336 = vrot.lane.b32.xlu1 %v307_v17, %s890_s23  ;;  %p815_p10 = por %p814_p7, %p813_p3 }
 0x115   : > { %p816_p13 = pnand %p815_p10, %p809_p12 }
 0x116   : > { %417 = vrot.lane.b32.xlu0 %v252_v16, %s895_s9 }
 0x117   : > { %399 = vrot.lane.b32.xlu1 %v256_v25, %s894_s25 }
 0x11a   : > { %421 = vrot.lane.b32.xlu0 %v413_v26, %s895_s9 }
 0x11b   : > { %419 = vrot.lane.b32.xlu1 %v307_v17, %s895_s9 }
 0x160   : > { %v383_v27 = vpop.permute.xlu0 %382 }
 0x161   : > { %v313_v28 = vpop.permute.xlu1 %312 }
 0x164   : > { %v339_v29 = vpop.permute.xlu0 %338 }
 0x165   : > { %v293_v30 = vpop.permute.xlu1 %292 }
 0x168   : > { %v261_v32 = vpop.permute.xlu0 %260 }
 0x169   : > { %v357_v31 = vpop.permute.xlu1 %356 }
 0x16c   : > { %v289_v34 = vpop.permute.xlu0 %288 }
 0x16d   : > { %v309_v33 = vpop.permute.xlu1 %308 }
 0x170   : > { %v353_v36 = vpop.permute.xlu0 %352 }
 0x171   : > { %v379_v35 = vpop.permute.xlu1 %378 }
 0x174   : > { %v402_v38 = vpop.permute.xlu0 %401 }
 0x175   : > { %v263_v37 = vpop.permute.xlu1 %262 }
 0x176   : > { %v266_v39 = vsel %vm264_vm9, %v261_v32, %v263_v37 }
 0x177   : > { %270 = vst [vmem:[#allocation3 + $0x8] sm:$0xf0] %v266_v39 }
 0x178   : > { %v335_v41 = vpop.permute.xlu0 %334 }
 0x179   : > { %v404_v40 = vpop.permute.xlu1 %403 }
 0x17a   : > { %v407_v43 = vsel %vm405_vm11, %v402_v38, %v404_v40 }
 0x17b   : > { %411 = vst [vmem:[#allocation3 + $0x38] sm:$0xf0] %v407_v43 }
 0x17c   : > { %v311_v46 = vpop.permute.xlu0 %310 }
 0x17d   : > { %v259_v47 = vpop.permute.xlu1 %258  ;;  %v315_v48 = vsel %vm314_vm12, %v309_v33, %v311_v46  ;;  %v316_v49 = vsel %vm314_vm12, %v311_v46, %v313_v28 }
 0x17e   : > { %v265_v50 = vsel %vm264_vm9, %v259_v47, %v261_v32  ;;  %v319_v51 = vsel %vm243_vm7, %v315_v48, 0.0  ;;  %v320_v52 = vsel %vm244_vm8, %v316_v49, 0.0  ;;  %v435_v14 = vld [vmem:[#allocation3 + $0x8] sm:$0xff] }
 0x17f   : > { %269 = vst [vmem:[#allocation3] sm:$0xf0] %v265_v50  ;;  %v323_v53 = vrot.slane %v319_v51, 4  ;;  %v324_v54 = vrot.slane %v320_v52, 4 }
 0x180   : > { %v291_v55 = vpop.permute.xlu0 %290 }
 0x181   : > { %v381_v56 = vpop.permute.xlu1 %380  ;;  %327 = vst [vmem:[#allocation3 + $0x10] sm:$0xf0] %v323_v53  ;;  %328 = vst [vmem:[#allocation3 + $0x18] sm:$0xf0] %v324_v54  ;;  %v295_v57 = vsel %vm294_vm13, %v289_v34, %v291_v55  ;;  %v296_v58 = vsel %vm294_vm13, %v291_v55, %v293_v30  ;;  %v432_v34 = vld [vmem:[#allocation9] sm:$0xff] }
 0x182   : > { %v385_v59 = vsel %vm384_vm14, %v379_v35, %v381_v56  ;;  %v386_v60 = vsel %vm384_vm14, %v381_v56, %v383_v27  ;;  %v299_v61 = vsel %vm283_vm15, %v295_v57, 0.0  ;;  %v300_v62 = vsel %vm284_vm0, %v296_v58, 0.0 }
 0x183   : > { %v389_v63 = vsel %vm243_vm7, %v385_v59, 0.0  ;;  %v390_v0 = vsel %vm244_vm8, %v386_v60, 0.0  ;;  %301 = vst [vmem:[#allocation3 + $0x10] sm:$0xf] %v299_v61  ;;  %302 = vst [vmem:[#allocation3 + $0x18] sm:$0xf] %v300_v62 }
 0x184   : > { %391 = vst [vmem:[#allocation3 + $0x30] sm:$0xf] %v389_v63  ;;  %392 = vst [vmem:[#allocation3 + $0x38] sm:$0xf] %v390_v0  ;;  %v355_v1 = vpop.permute.xlu0 %354 }
 0x185   : > { %v337_v2 = vpop.permute.xlu1 %336  ;;  %v359_v3 = vsel %vm358_vm1, %v353_v36, %v355_v1  ;;  %v360_v4 = vsel %vm358_vm1, %v355_v1, %v357_v31 }
 0x186   : > { %v341_v5 = vsel %vm340_vm2, %v335_v41, %v337_v2  ;;  %v342_v6 = vsel %vm340_vm2, %v337_v2, %v339_v29  ;;  %v363_v7 = vsel %vm283_vm15, %v359_v3, 0.0  ;;  %v364_v8 = vsel %vm284_vm0, %v360_v4, 0.0  ;;  %v434_v16 = vld [vmem:[#allocation3] sm:$0xff] }
 0x187   : > { %345 = vst [vmem:[#allocation3 + $0x20] sm:$0xf] %v341_v5  ;;  %346 = vst [vmem:[#allocation3 + $0x28] sm:$0xf] %v342_v6  ;;  %v367_v9 = vrot.slane %v363_v7, 4  ;;  %v368_v10 = vrot.slane %v364_v8, 4 }
 0x188   : > { %v418_v11 = vpop.permute.xlu0 %417 }
 0x189   : > { %v400_v12 = vpop.permute.xlu1 %399  ;;  %371 = vst [vmem:[#allocation3 + $0x20] sm:$0xf0] %v367_v9  ;;  %372 = vst [vmem:[#allocation3 + $0x28] sm:$0xf0] %v368_v10 }
 0x18a   : > { %v406_v13 = vsel %vm405_vm11, %v400_v12, %v402_v38  ;;  %v437_v15 = vld [vmem:[#allocation3 + $0x18] sm:$0xff]  ;;  %v436_v17 = vld [vmem:[#allocation3 + $0x10] sm:$0xff]  ;;  %v433_v38 = vpack.c.bf16 %v432_v34, %v432_v34 }
 0x18b   : > { %410 = vst [vmem:[#allocation3 + $0x30] sm:$0xf0] %v406_v13  ;;  %v445_v18 = vpack.c.bf16 %v437_v15, %v435_v14  ;;  %v444_v19 = vpack.c.bf16 %v436_v17, %v434_v16  ;;  %v441_v27 = vld [vmem:[#allocation3 + $0x38] sm:$0xff] }
 0x18c   : > { %v422_v20 = vpop.permute.xlu0 %421 }
 0x18d   : > { %v420_v21 = vpop.permute.xlu1 %419  ;;  %461 = vmatprep.subr.bf16.mxu0 %v445_v18 }
 0x18e   : > { %v424_v22 = vsel %vm423_vm3, %v418_v11, %v420_v21  ;;  %v425_v23 = vsel %vm423_vm3, %v420_v21, %v422_v20  ;;  %462 = vmatpush1.bf16.msra.mxu0 %v444_v19 }
 0x18f   : > { %v428_v24 = vsel %vm283_vm15, %v424_v22, 0.0  ;;  %v429_v25 = vsel %vm284_vm0, %v425_v23, 0.0 }
 0x190   : > { %430 = vst [vmem:[#allocation3 + $0x40] sm:$0xf] %v428_v24  ;;  %431 = vst [vmem:[#allocation3 + $0x48] sm:$0xf] %v429_v25  ;;  %v439_v26 = vld [vmem:[#allocation3 + $0x28] sm:$0xff]  ;;  %v438_v28 = vld [vmem:[#allocation3 + $0x20] sm:$0xff] }
 0x191   : > { %v447_v29 = vpack.c.bf16 %v441_v27, %v439_v26 }
 0x192   : > { %v440_v30 = vld [vmem:[#allocation3 + $0x30] sm:$0xff] }
 0x193   : > { %v446_v31 = vpack.c.bf16 %v440_v30, %v438_v28  ;;  %463 = vmatprep.subr.bf16.mxu0 %v447_v29 }
 0x195   : > { %464 = vmatpush1.bf16.msra.mxu0 %v446_v31 }
 0x197   : > { %v443_v32 = vld [vmem:[#allocation3 + $0x48] sm:$0xf]  ;;  %v442_v33 = vld [vmem:[#allocation3 + $0x40] sm:$0xf] }
 0x198   : > { %v449_v35 = vpack.c.bf16 %v443_v32, %v443_v32  ;;  %v448_v36 = vpack.c.bf16 %v442_v33, %v442_v33 }
 0x19a   : > { %629 = vmatprep.subr.msk.bf16.mxu0 %vm454_vm4, %v449_v35  ;;  %v456_v37 = vsel %vm454_vm4, %v448_v36, 0 }
 0x19b   : > { %466 = vmatpush1.bf16.msra.mxu0 %v456_v37 }
 0x19e   : > { %630 = vmatmul.mubr.msk.bf16.vlgmr.msra.gmra.mrb[0].mxu0 %vm450_vm5, %v433_v38 }
 0x271   : > { %v495_v39 = vpop.f32.mrb[0].mxu0 }
 0x272   : > { %vm502_vm6 = vcmp.ge.f32.partialorder %v495_v39, 0.0  ;;  %v504_v40 = vmul.f32 0.1, %v495_v39  ;;  %v497_v41 = vpop.f32.mrb[1].mxu0 }
 0x273   : > { %vm503_vm7 = vcmp.ge.f32.partialorder %v497_v41, 0.0  ;;  %v505_v42 = vmul.f32 0.1, %v497_v41  ;;  %v499_v43 = vpop.f32.mrb[2].mxu0 }
 0x274   : > { %v506_v44 = vsel %vm502_vm6, %v495_v39, %v504_v40  ;;  %v500_v45 = vpop.f32.mrb[3].mxu0 }
 0x275   : > { %508 = vst [vmem:[%s211_s11] sm:$0xff] %v506_v44  ;;  %v507_v46 = vsel %vm503_vm7, %v497_v41, %v505_v42 }
 0x276   : > { %509 = vst [vmem:[%s211_s11 + $0x8] sm:$0xff] %v507_v46 }
 0x277   : > { %819 = shalt.err (!%p816_p13)
}
 0x278   : > { %s820_s21 = scalar_lea.hbm %s1173_s30, 256  ;;  %s824_s4 = scalar_lea.hbm %s1220_s3, 512 }
 0x279   : > { %p821_p5 = scmp.ne.s32.totalorder %s1173_s30, %s820_s21  ;;  %p825_p11 = scmp.lt.u32.totalorder %s1173_s30, %s1220_s3 }
 0x27a   : > { %p826_p2 = scmp.lt.u32.totalorder %s824_s4, %s820_s21  ;;  %p828_p4 = scmp.lt.u32.totalorder %s820_s21, %s1173_s30 }
 0x27b   : > { %p822_p0 = pnand %p821_p5, %p1036_p6 }
 0x27c   : > { %p827_p1 = por %p826_p2, %p825_p11 }
 0x27d   : > { %p823_p9 = pneg %p822_p0 }
 0x27e   : > { %p829_p8 = por %p828_p4, %p827_p1 }
 0x280   : > { %p830_p12 = pnand %p829_p8, %p823_p9 }
 0x282   : > { %833 = shalt.err (!%p830_p12)
}
 0x283   : > { %648 = dma.vmem_to_hbm [thread:$0]  (%p1036_p6), %s1175_s17, 256, %s1173_s30, %s511_s16  }
 0x284 PF: > { %s537_s9 = sand.u32 1, %s868_s12   ;;  %p1237_p3 = scmp.ne.s32.totalorder %s1225_s19, 0 }
 0x285   : > { %p1238_p7 = scmp.ge.s32.totalorder %s880_s15, 2  ;;  %s538_s8 = scalar_lea.sflag [#allocation6], %s537_s9 }
 0x287   : > { %p662_p10 = pnand %p1238_p7, %p1237_p3 }
 0x289   : > { %863 = dma.done.wait (!%p662_p10), %s538_s8, 256  }
 0x28a   : > { %865 = vsyncadd (!%p662_p10), %s538_s8, 4294967040  ;;  %p17_p13 = scmp.ge.s32.totalorder %s973_s26, 4   ;;  %s1239_s12 = smov %s872_s13 }
 0x28b   : > { %s1240_s13 = smov %s876_s14  ;;  %s1241_s14 = smov %s1032_s6 }
 0x28c   : > { %s1242_s15 = smov %s973_s26  ;;  %19 = sbr.rel (!%p17_p13) target bundleno = 6 (0x6), region = 86 }
 0x293   :  { %543 = vsyncpa [#allocation5], 1 }
 0x294   :  { %545 = vsyncpa [#allocation5 + $0x1], 1 }
 0x295   :  { %546 = vsyncpa [#allocation8], 1 }
 0x296   :  { %548 = vsyncpa [#allocation8 + $0x1], 1 }
 0x297   :  { %549 = vsyncpa [#allocation6], 1 }
 0x298   :  { %551 = vsyncpa [#allocation6 + $0x1], 1 }

</bundles_post_ra>
